<compile_context>
chip_gen: v6e
topology: v6e:2x2x1
jax: 0.10.0
libtpu: 0.0.40
codegen_flags: <defaults>
</compile_context>

<pallas_src>
import jax
import jax.numpy as jnp
from jax.experimental import pallas as pl
from jax.experimental.pallas import tpu as pltpu


def _round_up(x, m):
    return ((x + m - 1) // m) * m


def _cdiv(a, b):
    return -(-a // b)


def decoder_kernel(z_ref, w1_ref, b1_ref, w2_ref, b2_ref, out_ref):
    # In-kernel f32 -> bf16 cast of the activation tile: cheap VPU work that
    # hides under the MXU and avoids an extra HBM pad/cast pass in the wrapper.
    z = z_ref[...].astype(jnp.bfloat16)
    # fc1 on the MXU with f32 accumulation; bias add + ReLU on the VPU.
    h = jnp.dot(z, w1_ref[...], preferred_element_type=jnp.float32)
    h = jnp.maximum(h + b1_ref[...], 0.0)                 # (tm, H) + (1, H)
    # fc2: bf16 operands again for the fast MXU path, f32 accumulation.
    o = jnp.dot(h.astype(jnp.bfloat16), w2_ref[...],
                preferred_element_type=jnp.float32)
    out_ref[...] = (o + b2_ref[...]).astype(out_ref.dtype)


def _pick_row_tile(B, H, target=256):
    """Row-tile size: MXU-friendly, minimal batch padding, bounded f32 `h`."""
    b8 = _round_up(max(B, 1), 8)
    cands = {c for c in (target, 128, 64) if c <= b8}
    if b8 <= target:
        cands.add(b8)                                     # exact fit for small/awkward B
    if B >= 16:
        # Half-batch tile so a v7x chip can put one tile on each TensorCore.
        cands.add(min(target, _round_up(_cdiv(B, 2), 8)))
    # Bound the live f32 (tm, H) intermediate to ~4 MiB (vreg/VMEM pressure).
    tm_cap = max(8, ((4 << 20) // max(4 * H, 32)) // 8 * 8)
    cands = {min(c, tm_cap) for c in cands}
    # Prefer minimal padded rows, then >=2 tiles (megacore), then larger tiles.
    def cost(c):
        padded = _round_up(B, c) - B
        two_tiles = 0 if _round_up(B, c) // c >= 2 else 1
        return (padded, two_tiles, -c)
    return min(cands, key=cost)


def _vmem_capacity_bytes():
    try:
        cap = getattr(pltpu.get_tpu_info(), "vmem_capacity_bytes", None)
        if cap:
            return int(cap)
    except Exception:
        pass
    return 64 << 20   # conservative default: v7x per-TensorCore VMEM


def decoder_forward(z, w1, b1, w2, b2, *, out_dtype=None):
    """z: (B, D_in), w1: (D_in, H), b1: (H,), w2: (H, D_out), b2: (D_out,)."""
    B, D_in = z.shape
    H = w1.shape[1]
    D_out = w2.shape[1]
    # Pass out_dtype=jnp.bfloat16 to halve output HBM writes if downstream allows.
    out_dtype = out_dtype or z.dtype

    tm = _pick_row_tile(B, H)
    b_p = _round_up(B, tm)
    grid = (b_p // tm,)

    # Only batch rows are (cheaply) padded, and only when B % tm != 0.
    # Feature dims stay unpadded: full-dim blocks are legal even when < (8,128).
    z_in = z if b_p == B else jnp.pad(z, ((0, b_p - B), (0, 0)))

    # Weights in bf16 for the MXU (tiny one-time cast); biases stay f32.
    w1_b = w1.astype(jnp.bfloat16)
    w2_b = w2.astype(jnp.bfloat16)
    b1_2d = b1.reshape(1, H).astype(jnp.float32)
    b2_2d = b2.reshape(1, D_out).astype(jnp.float32)

    # TODO(synk): if bf16 weights (D_in*H + H*D_out) outgrow weight residency
    # (~20-24 MiB on v7x's 64 MiB VMEM, ~40-48 MiB on v5e/v6e 128 MiB), add a
    # K-reduction grid axis ("arbitrary") with an f32 VMEM accumulator.

    z_bytes = jnp.dtype(z.dtype).itemsize
    o_bytes = jnp.dtype(out_dtype).itemsize
    required = (2 * tm * D_in * z_bytes            # double-buffered z tiles
                + 2 * tm * D_out * o_bytes         # double-buffered out tiles
                + 2 * (D_in * H + H * D_out) * 2   # bf16 weights (worst-case 2 bufs)
                + 2 * (H + D_out) * 4              # f32 biases
                + tm * H * 4)                      # f32 intermediate h
    vmem_limit = int(min(_vmem_capacity_bytes() * 3 // 4,
                         max(32 << 20, 2 * required)))

    cost = pl.CostEstimate(
        flops=2 * b_p * (D_in * H + H * D_out),
        transcendentals=0,
        bytes_accessed=int(b_p * D_in * z_bytes
                           + (D_in * H + H * D_out) * 2
                           + (H + D_out) * 4
                           + b_p * D_out * o_bytes),
    )

    def make_call(single_buffer_weights):
        def const_spec(shape):
            # Invariant blocks (constant index_map): single-buffer them so the
            # pipeline doesn't allocate 2x VMEM for data that never changes.
            if single_buffer_weights:
                return pl.BlockSpec(shape, lambda i: (0, 0),
                                    pipeline_mode=pl.Buffered(1))
            return pl.BlockSpec(shape, lambda i: (0, 0))

        return pl.pallas_call(
            decoder_kernel,
            out_shape=jax.ShapeDtypeStruct((b_p, D_out), out_dtype),
            grid_spec=pltpu.PrefetchScalarGridSpec(
                num_scalar_prefetch=0,
                grid=grid,
                in_specs=[
                    pl.BlockSpec((tm, D_in), lambda i: (i, 0)),   # z: streamed
                    const_spec((D_in, H)),                        # w1: resident
                    const_spec((1, H)),                           # b1: resident
                    const_spec((H, D_out)),                       # w2: resident
                    const_spec((1, D_out)),                       # b2: resident
                ],
                out_specs=pl.BlockSpec((tm, D_out), lambda i: (i, 0)),
            ),
            compiler_params=pltpu.CompilerParams(
                dimension_semantics=("parallel",),   # batch tiles across TCs
                vmem_limit_bytes=vmem_limit,
            ),
            cost_estimate=cost,
        )

    try:
        out_p = make_call(True)(z_in, w1_b, b1_2d, w2_b, b2_2d)
    except Exception:
        # Fallback if this JAX build rejects Buffered(1) on invariant inputs:
        # default double-buffering (same math, slightly more VMEM).
        out_p = make_call(False)(z_in, w1_b, b1_2d, w2_b, b2_2d)

    return out_p if b_p == B else out_p[:B]


def reference_forward(z, w1, b1, w2, b2):
    h = jnp.maximum(z @ w1 + b1, 0.0)
    return h @ w2 + b2


if __name__ == "__main__":
    # Small shapes consistent with the module's forward: z is (batch, input_dim).
    batch, input_dim, hidden, output_dim = 8, 16, 32, 12

    key = jax.random.PRNGKey(0)
    k_z, k_w1, k_b1, k_w2, k_b2 = jax.random.split(key, 5)

    z = jax.random.normal(k_z, (batch, input_dim), dtype=jnp.float32)

    # Deterministic parameter init (mimics nn.Linear's uniform(-1/sqrt(fan_in), +)).
    def linear_init(kw, kb, fan_in, fan_out):
        bound = 1.0 / jnp.sqrt(fan_in)
        w = jax.random.uniform(kw, (fan_in, fan_out), jnp.float32, -bound, bound)
        b = jax.random.uniform(kb, (fan_out,), jnp.float32, -bound, bound)
        return w, b

    w1, b1 = linear_init(k_w1, k_b1, input_dim, hidden)
    w2, b2 = linear_init(k_w2, k_b2, hidden, output_dim)

    out = decoder_forward(z, w1, b1, w2, b2)
    out = jax.block_until_ready(out)

    ref = reference_forward(z, w1, b1, w2, b2)
    assert out.shape == (batch, output_dim)
    # bf16 operands with f32 accumulation: loosen tolerance vs. f32 reference.
    assert jnp.allclose(out, ref, atol=5e-2, rtol=5e-2), (
        f"max abs err {jnp.max(jnp.abs(out - ref))}")

    print("KERNEL_OK")
</pallas_src>

<mosaic_0001>
module attributes {stable_mosaic.version = 11 : i64} {
  func.func @decoder_kernel(%arg0: i32, %arg1: memref<8x16xf32, #tpu.memory_space<vmem>>, %arg2: memref<16x32xbf16, #tpu.memory_space<vmem>>, %arg3: memref<1x32xf32, #tpu.memory_space<vmem>>, %arg4: memref<32x12xbf16, #tpu.memory_space<vmem>>, %arg5: memref<1x12xf32, #tpu.memory_space<vmem>>, %arg6: memref<8x12xf32, #tpu.memory_space<vmem>>) attributes {dimension_semantics = [#tpu.dimension_semantics<parallel>], iteration_bounds = array<i64: 1>, scalar_prefetch = 0 : i64, scratch_operands = 0 : i64, tpu.core_type = #tpu.core_type<tc>, window_params = [{transform_indices = @transform_0, window_bounds = array<i64: 8, 16>}, {pipeline_mode = #tpu.pipeline_mode<synchronous>, transform_indices = @transform_1, window_bounds = array<i64: 16, 32>}, {pipeline_mode = #tpu.pipeline_mode<synchronous>, transform_indices = @transform_2, window_bounds = array<i64: 1, 32>}, {pipeline_mode = #tpu.pipeline_mode<synchronous>, transform_indices = @transform_3, window_bounds = array<i64: 32, 12>}, {pipeline_mode = #tpu.pipeline_mode<synchronous>, transform_indices = @transform_4, window_bounds = array<i64: 1, 12>}, {transform_indices = @transform_5, window_bounds = array<i64: 8, 12>}]} {
    %c0 = arith.constant 0 : index
    %c0_0 = arith.constant 0 : index
    %0 = vector.load %arg1[%c0, %c0_0] : memref<8x16xf32, #tpu.memory_space<vmem>>, vector<8x16xf32>
    %1 = arith.truncf %0 : vector<8x16xf32> to vector<8x16xbf16>
    %c0_1 = arith.constant 0 : index
    %c0_2 = arith.constant 0 : index
    %2 = vector.load %arg2[%c0_1, %c0_2] : memref<16x32xbf16, #tpu.memory_space<vmem>>, vector<16x32xbf16>
    %cst = arith.constant dense<0.000000e+00> : vector<8x32xf32>
    %3 = tpu.matmul %1, %2, %cst {dimension_numbers = #tpu.dot_dimension_numbers<[1], [0], [0], [1], [0, 0, 1, 1], [], []>} : vector<8x16xbf16>, vector<16x32xbf16>, vector<8x32xf32> -> vector<8x32xf32>
    %c0_3 = arith.constant 0 : index
    %c0_4 = arith.constant 0 : index
    %4 = vector.load %arg3[%c0_3, %c0_4] : memref<1x32xf32, #tpu.memory_space<vmem>>, vector<1x32xf32>
    %5 = vector.broadcast %4 : vector<1x32xf32> to vector<8x32xf32>
    %6 = arith.addf %3, %5 : vector<8x32xf32>
    %cst_5 = arith.constant 0.000000e+00 : f32
    %7 = vector.broadcast %cst_5 : f32 to vector<8x32xf32>
    %8 = arith.maximumf %6, %7 : vector<8x32xf32>
    %9 = arith.truncf %8 : vector<8x32xf32> to vector<8x32xbf16>
    %c0_6 = arith.constant 0 : index
    %c0_7 = arith.constant 0 : index
    %10 = vector.load %arg4[%c0_6, %c0_7] : memref<32x12xbf16, #tpu.memory_space<vmem>>, vector<32x12xbf16>
    %cst_8 = arith.constant dense<0.000000e+00> : vector<8x12xf32>
    %11 = tpu.matmul %9, %10, %cst_8 {dimension_numbers = #tpu.dot_dimension_numbers<[1], [0], [0], [1], [0, 0, 1, 1], [], []>} : vector<8x32xbf16>, vector<32x12xbf16>, vector<8x12xf32> -> vector<8x12xf32>
    %c0_9 = arith.constant 0 : index
    %c0_10 = arith.constant 0 : index
    %12 = vector.load %arg5[%c0_9, %c0_10] : memref<1x12xf32, #tpu.memory_space<vmem>>, vector<1x12xf32>
    %13 = vector.broadcast %12 : vector<1x12xf32> to vector<8x12xf32>
    %14 = arith.addf %11, %13 : vector<8x12xf32>
    %c0_11 = arith.constant 0 : index
    %c0_12 = arith.constant 0 : index
    %15 = vector.load %arg6[%c0_11, %c0_12] : memref<8x12xf32, #tpu.memory_space<vmem>>, vector<8x12xf32>
    tpu.vector_store %arg6[%c0_11, %c0_12], %14 {strides = array<i32>} : memref<8x12xf32, #tpu.memory_space<vmem>>, vector<8x12xf32>,
    return
  }
  func.func @transform_0(%arg0: i32) -> (i32, i32) {
    %c0_i32 = arith.constant 0 : i32
    %c0_i32_0 = arith.constant 0 : i32
    return %arg0, %c0_i32 : i32, i32
  }
  func.func @transform_1(%arg0: i32) -> (i32, i32) {
    %c0_i32 = arith.constant 0 : i32
    %c0_i32_0 = arith.constant 0 : i32
    %c0_i32_1 = arith.constant 0 : i32
    return %c0_i32, %c0_i32_0 : i32, i32
  }
  func.func @transform_2(%arg0: i32) -> (i32, i32) {
    %c0_i32 = arith.constant 0 : i32
    %c0_i32_0 = arith.constant 0 : i32
    %c0_i32_1 = arith.constant 0 : i32
    return %c0_i32, %c0_i32_0 : i32, i32
  }
  func.func @transform_3(%arg0: i32) -> (i32, i32) {
    %c0_i32 = arith.constant 0 : i32
    %c0_i32_0 = arith.constant 0 : i32
    %c0_i32_1 = arith.constant 0 : i32
    return %c0_i32, %c0_i32_0 : i32, i32
  }
  func.func @transform_4(%arg0: i32) -> (i32, i32) {
    %c0_i32 = arith.constant 0 : i32
    %c0_i32_0 = arith.constant 0 : i32
    %c0_i32_1 = arith.constant 0 : i32
    return %c0_i32, %c0_i32_0 : i32, i32
  }
  func.func @transform_5(%arg0: i32) -> (i32, i32) {
    %c0_i32 = arith.constant 0 : i32
    %c0_i32_0 = arith.constant 0 : i32
    return %arg0, %c0_i32 : i32, i32
  }
}

module attributes {stable_mosaic.version = 11 : i64} {
  func.func @decoder_kernel(%arg0: i32, %arg1: memref<8x16xf32, #tpu.memory_space<vmem>>, %arg2: memref<16x32xbf16, #tpu.memory_space<vmem>>, %arg3: memref<1x32xf32, #tpu.memory_space<vmem>>, %arg4: memref<32x12xbf16, #tpu.memory_space<vmem>>, %arg5: memref<1x12xf32, #tpu.memory_space<vmem>>, %arg6: memref<8x12xf32, #tpu.memory_space<vmem>>) attributes {dimension_semantics = [#tpu.dimension_semantics<parallel>], iteration_bounds = array<i64: 1>, scalar_prefetch = 0 : i64, scratch_operands = 0 : i64, tpu.core_type = #tpu.core_type<tc>, window_params = [{transform_indices = @transform_0, window_bounds = array<i64: 8, 16>}, {pipeline_mode = #tpu.pipeline_mode<synchronous>, transform_indices = @transform_1, window_bounds = array<i64: 16, 32>}, {pipeline_mode = #tpu.pipeline_mode<synchronous>, transform_indices = @transform_2, window_bounds = array<i64: 1, 32>}, {pipeline_mode = #tpu.pipeline_mode<synchronous>, transform_indices = @transform_3, window_bounds = array<i64: 32, 12>}, {pipeline_mode = #tpu.pipeline_mode<synchronous>, transform_indices = @transform_4, window_bounds = array<i64: 1, 12>}, {transform_indices = @transform_5, window_bounds = array<i64: 8, 12>}]} {
    %c0 = arith.constant 0 : index
    %c0_0 = arith.constant 0 : index
    %0 = vector.load %arg1[%c0, %c0_0] : memref<8x16xf32, #tpu.memory_space<vmem>>, vector<8x16xf32>
    %1 = arith.truncf %0 : vector<8x16xf32> to vector<8x16xbf16>
    %c0_1 = arith.constant 0 : index
    %c0_2 = arith.constant 0 : index
    %2 = vector.load %arg2[%c0_1, %c0_2] : memref<16x32xbf16, #tpu.memory_space<vmem>>, vector<16x32xbf16>
    %cst = arith.constant dense<0.000000e+00> : vector<8x32xf32>
    %3 = tpu.matmul %1, %2, %cst {dimension_numbers = #tpu.dot_dimension_numbers<[1], [0], [0], [1], [0, 0, 1, 1], [], []>} : vector<8x16xbf16>, vector<16x32xbf16>, vector<8x32xf32> -> vector<8x32xf32>
    %c0_3 = arith.constant 0 : index
    %c0_4 = arith.constant 0 : index
    %4 = vector.load %arg3[%c0_3, %c0_4] : memref<1x32xf32, #tpu.memory_space<vmem>>, vector<1x32xf32>
    %5 = vector.broadcast %4 : vector<1x32xf32> to vector<8x32xf32>
    %6 = arith.addf %3, %5 : vector<8x32xf32>
    %cst_5 = arith.constant 0.000000e+00 : f32
    %7 = vector.broadcast %cst_5 : f32 to vector<8x32xf32>
    %8 = arith.maximumf %6, %7 : vector<8x32xf32>
    %9 = arith.truncf %8 : vector<8x32xf32> to vector<8x32xbf16>
    %c0_6 = arith.constant 0 : index
    %c0_7 = arith.constant 0 : index
    %10 = vector.load %arg4[%c0_6, %c0_7] : memref<32x12xbf16, #tpu.memory_space<vmem>>, vector<32x12xbf16>
    %cst_8 = arith.constant dense<0.000000e+00> : vector<8x12xf32>
    %11 = tpu.matmul %9, %10, %cst_8 {dimension_numbers = #tpu.dot_dimension_numbers<[1], [0], [0], [1], [0, 0, 1, 1], [], []>} : vector<8x32xbf16>, vector<32x12xbf16>, vector<8x12xf32> -> vector<8x12xf32>
    %c0_9 = arith.constant 0 : index
    %c0_10 = arith.constant 0 : index
    %12 = vector.load %arg5[%c0_9, %c0_10] : memref<1x12xf32, #tpu.memory_space<vmem>>, vector<1x12xf32>
    %13 = vector.broadcast %12 : vector<1x12xf32> to vector<8x12xf32>
    %14 = arith.addf %11, %13 : vector<8x12xf32>
    %c0_11 = arith.constant 0 : index
    %c0_12 = arith.constant 0 : index
    %15 = vector.load %arg6[%c0_11, %c0_12] : memref<8x12xf32, #tpu.memory_space<vmem>>, vector<8x12xf32>
    tpu.vector_store %arg6[%c0_11, %c0_12], %14 {strides = array<i32>} : memref<8x12xf32, #tpu.memory_space<vmem>>, vector<8x12xf32>,
    return
  }
  func.func @transform_0(%arg0: i32) -> (i32, i32) {
    %c0_i32 = arith.constant 0 : i32
    %c0_i32_0 = arith.constant 0 : i32
    return %arg0, %c0_i32 : i32, i32
  }
  func.func @transform_1(%arg0: i32) -> (i32, i32) {
    %c0_i32 = arith.constant 0 : i32
    %c0_i32_0 = arith.constant 0 : i32
    %c0_i32_1 = arith.constant 0 : i32
    return %c0_i32, %c0_i32_0 : i32, i32
  }
  func.func @transform_2(%arg0: i32) -> (i32, i32) {
    %c0_i32 = arith.constant 0 : i32
    %c0_i32_0 = arith.constant 0 : i32
    %c0_i32_1 = arith.constant 0 : i32
    return %c0_i32, %c0_i32_0 : i32, i32
  }
  func.func @transform_3(%arg0: i32) -> (i32, i32) {
    %c0_i32 = arith.constant 0 : i32
    %c0_i32_0 = arith.constant 0 : i32
    %c0_i32_1 = arith.constant 0 : i32
    return %c0_i32, %c0_i32_0 : i32, i32
  }
  func.func @transform_4(%arg0: i32) -> (i32, i32) {
    %c0_i32 = arith.constant 0 : i32
    %c0_i32_0 = arith.constant 0 : i32
    %c0_i32_1 = arith.constant 0 : i32
    return %c0_i32, %c0_i32_0 : i32, i32
  }
  func.func @transform_5(%arg0: i32) -> (i32, i32) {
    %c0_i32 = arith.constant 0 : i32
    %c0_i32_0 = arith.constant 0 : i32
    return %arg0, %c0_i32 : i32, i32
  }
}

</mosaic_0001>

<bundles_post_ra>
// kernel: tpu_custom_call.1
= control target key start
LH: loop header
LB: loop body
LE: loop exit
PB: predicated region body
PF: predicated region fallthrough
CT: control target
= control target key end

     0   :  { %v222_v1 = vmov 0.0   ;;  %vm39_vm0 = vcmask 130048   ;;  %vm223_vm1 = vmmov 0   ;;  %s276_s0 = inlined_call_operand.vmem [shape: f32[8,16], index: 0, kind: input, shape index: {}]   ;;  %s277_s1 = inlined_call_operand.vmem [shape: bf16[16,32], index: 1, kind: input, shape index: {}]   ;;  %s278_s2 = inlined_call_operand.vmem [shape: f32[1,32], index: 2, kind: input, shape index: {}]   ;;  %s279_s3 = inlined_call_operand.vmem [shape: bf16[32,12], index: 3, kind: input, shape index: {}]   ;;  %s280_s4 = inlined_call_operand.vmem [shape: f32[1,12], index: 4, kind: input, shape index: {}]   ;;  %s281_s5 = inlined_call_operand.hbm [shape: f32[8,12], index: 5, kind: output, shape index: {}]  }
   0x1   :  { %v197_v0 = vld [vmem:[%s277_s1] sm:$0xff]   ;;  %180 = vmatprep.subr.bf16.mxu0 %v222_v1  ;;  %186 = vmatprep.subr.bf16.mxu1 %v222_v1 }
   0x2   :  { %v22_v2 = vld [vmem:[%s276_s0] sm:$0xff]  ;;  %181 = vmatpush3.bf16.msra.mxu0 %v197_v0  ;;  %182 = vmatprep.mubr.msk.bf16.mxu0 %vm223_vm1, %v222_v1 }
   0x3   :  { %v23_v3 = vpack.c.bf16 %v22_v2, %v22_v2  ;;  %190 = vmatprep.mubr.msk.bf16.mxu1 %vm223_vm1, %v222_v1 }
   0x4   :  { %10 = vsyncpa [#allocation3], 0  ;;  %v198_v4 = vld [vmem:[%s279_s3 + $0x8] sm:$0xff]   ;;  %v199_v5 = vld [vmem:[%s279_s3] sm:$0xff]   ;;  %vm108_vm2 = vcmask 261120   ;;  %s224_s28 = smov [#allocation2]  }
   0x5   :  { %183 = vmatmul.mubr.msk.bf16.vlgmr.msra.gmra.mxu0 %vm39_vm0, %v23_v3  ;;  %187 = vmatpush3.bf16.msra.mxu1 %v198_v4  ;;  %v168_v6 = vld [vmem:[%s278_s2] ss:$0 sm:$0xff]  ;;  %s160_s3 = sshll.u32 %s224_s28, 4  ;;  %vm152_vm3 = vcmask 97280   ;;  %s161_s3 = int_to_ptr.vmem [resolvable:$true] %s160_s3 }
   0x6   :  { %188 = vmatprep.subr.bf16.mxu1 %v222_v1  ;;  %v171_v14 = vld [vmem:[%s280_s4] ss:$0 sm:$0xff]  ;;  %s200_s2 = scalar_lea.vmem %s161_s3, 128  ;;  %p205_p1 = scmp.lt.s32.totalorder %s161_s3, %s161_s3 }
   0x7   :  { %p201_p0 = scmp.ne.s32.totalorder %s161_s3, %s200_s2  ;;  %p206_p2 = scmp.lt.s32.totalorder %s200_s2, %s200_s2 }
   0x9   :  { %189 = vmatpush3.bf16.msra.mxu1 %v199_v5  ;;  %p207_p3 = por %p206_p2, %p205_p1 }
   0xb   :  { %p208_p4 = pnand %p207_p3, %p201_p0 }
  0xc5   :  { %v77_v7 = vpop.f32.mrf.mxu0 }
  0xc6   :  { %v78_v8 = vadd.f32 %v168_v6, %v77_v7 }
  0xc7   :  { %v184_v9 = vpop.f32.mrf.mxu0 }
  0xc8   :  { %v83_v10 = vmax.f32 %v78_v8, 0.0 }
  0xc9   :  { %v80_v11 = vpop.f32.mrf.mxu0 }
  0xca   :  { %v84_v12 = vpack.c.bf16 %v83_v10, %v83_v10 }
  0xcb   :  { %v185_v13 = vpop.f32.mrf.mxu0 }
  0xcc   :  { %191 = vmatmul.mubr.msk.bf16.vlgmr.msra.gmra.mxu1 %vm108_vm2, %v84_v12 }
 0x18c   :  { %v146_v15 = vpop.f32.mrf.mxu1 }
 0x18d   :  { %v147_v16 = vadd.f32 %v171_v14, %v146_v15 }
 0x18e   :  { %v192_v17 = vpop.f32.mrf.mxu1 }
 0x18f   :  { %153 = vst.msk [vmem:[#allocation2] sm:$0xff] %vm152_vm3, %v147_v16 }
 0x190   :  { %v149_v18 = vpop.f32.mrf.mxu1 }
 0x191   :  { %211 = shalt.err (!%p208_p4)
}
 0x192   :  { %163 = dma.vmem_to_hbm [thread:$0]  %s161_s3, 128, %s281_s5, [#allocation3]   ;;  %v193_v19 = vpop.f32.mrf.mxu1 }
 0x193   :  { %220 = dma.done.wait [#allocation3], 128  }
 0x194   :  { %221 = vsyncadd [#allocation3], 4294967168 }
 0x195   :  { %167 = vsyncpa [#allocation3], 1 }

// kernel: tpu_custom_call.1
= control target key start
LH: loop header
LB: loop body
LE: loop exit
PB: predicated region body
PF: predicated region fallthrough
CT: control target
= control target key end

     0   :  { %v222_v1 = vmov 0.0   ;;  %vm39_vm0 = vcmask 130048   ;;  %vm223_vm1 = vmmov 0   ;;  %s276_s0 = inlined_call_operand.vmem [shape: f32[8,16], index: 0, kind: input, shape index: {}]   ;;  %s277_s1 = inlined_call_operand.vmem [shape: bf16[16,32], index: 1, kind: input, shape index: {}]   ;;  %s278_s2 = inlined_call_operand.vmem [shape: f32[1,32], index: 2, kind: input, shape index: {}]   ;;  %s279_s3 = inlined_call_operand.vmem [shape: bf16[32,12], index: 3, kind: input, shape index: {}]   ;;  %s280_s4 = inlined_call_operand.vmem [shape: f32[1,12], index: 4, kind: input, shape index: {}]   ;;  %s281_s5 = inlined_call_operand.hbm [shape: f32[8,12], index: 5, kind: output, shape index: {}]  }
   0x1   :  { %v197_v0 = vld [vmem:[%s277_s1] sm:$0xff]   ;;  %180 = vmatprep.subr.bf16.mxu0 %v222_v1  ;;  %186 = vmatprep.subr.bf16.mxu1 %v222_v1 }
   0x2   :  { %v22_v2 = vld [vmem:[%s276_s0] sm:$0xff]  ;;  %181 = vmatpush3.bf16.msra.mxu0 %v197_v0  ;;  %182 = vmatprep.mubr.msk.bf16.mxu0 %vm223_vm1, %v222_v1 }
   0x3   :  { %v23_v3 = vpack.c.bf16 %v22_v2, %v22_v2  ;;  %190 = vmatprep.mubr.msk.bf16.mxu1 %vm223_vm1, %v222_v1 }
   0x4   :  { %10 = vsyncpa [#allocation3], 0  ;;  %v198_v4 = vld [vmem:[%s279_s3 + $0x8] sm:$0xff]   ;;  %v199_v5 = vld [vmem:[%s279_s3] sm:$0xff]   ;;  %vm108_vm2 = vcmask 261120   ;;  %s224_s28 = smov [#allocation2]  }
   0x5   :  { %183 = vmatmul.mubr.msk.bf16.vlgmr.msra.gmra.mxu0 %vm39_vm0, %v23_v3  ;;  %187 = vmatpush3.bf16.msra.mxu1 %v198_v4  ;;  %v168_v6 = vld [vmem:[%s278_s2] ss:$0 sm:$0xff]  ;;  %s160_s3 = sshll.u32 %s224_s28, 4  ;;  %vm152_vm3 = vcmask 97280   ;;  %s161_s3 = int_to_ptr.vmem [resolvable:$true] %s160_s3 }
   0x6   :  { %188 = vmatprep.subr.bf16.mxu1 %v222_v1  ;;  %v171_v14 = vld [vmem:[%s280_s4] ss:$0 sm:$0xff]  ;;  %s200_s2 = scalar_lea.vmem %s161_s3, 128  ;;  %p205_p1 = scmp.lt.s32.totalorder %s161_s3, %s161_s3 }
   0x7   :  { %p201_p0 = scmp.ne.s32.totalorder %s161_s3, %s200_s2  ;;  %p206_p2 = scmp.lt.s32.totalorder %s200_s2, %s200_s2 }
   0x9   :  { %189 = vmatpush3.bf16.msra.mxu1 %v199_v5  ;;  %p207_p3 = por %p206_p2, %p205_p1 }
   0xb   :  { %p208_p4 = pnand %p207_p3, %p201_p0 }
  0xc5   :  { %v77_v7 = vpop.f32.mrf.mxu0 }
  0xc6   :  { %v78_v8 = vadd.f32 %v168_v6, %v77_v7 }
  0xc7   :  { %v184_v9 = vpop.f32.mrf.mxu0 }
  0xc8   :  { %v83_v10 = vmax.f32 %v78_v8, 0.0 }
  0xc9   :  { %v80_v11 = vpop.f32.mrf.mxu0 }
  0xca   :  { %v84_v12 = vpack.c.bf16 %v83_v10, %v83_v10 }
  0xcb   :  { %v185_v13 = vpop.f32.mrf.mxu0 }
  0xcc   :  { %191 = vmatmul.mubr.msk.bf16.vlgmr.msra.gmra.mxu1 %vm108_vm2, %v84_v12 }
 0x18c   :  { %v146_v15 = vpop.f32.mrf.mxu1 }
 0x18d   :  { %v147_v16 = vadd.f32 %v171_v14, %v146_v15 }
 0x18e   :  { %v192_v17 = vpop.f32.mrf.mxu1 }
 0x18f   :  { %153 = vst.msk [vmem:[#allocation2] sm:$0xff] %vm152_vm3, %v147_v16 }
 0x190   :  { %v149_v18 = vpop.f32.mrf.mxu1 }
 0x191   :  { %211 = shalt.err (!%p208_p4)
}
 0x192   :  { %163 = dma.vmem_to_hbm [thread:$0]  %s161_s3, 128, %s281_s5, [#allocation3]   ;;  %v193_v19 = vpop.f32.mrf.mxu1 }
 0x193   :  { %220 = dma.done.wait [#allocation3], 128  }
 0x194   :  { %221 = vsyncadd [#allocation3], 4294967168 }
 0x195   :  { %167 = vsyncpa [#allocation3], 1 }

</bundles_post_ra>
